<compile_context>
chip_gen: v5e
topology: v5e:2x2
jax: 0.10.0
libtpu: 0.0.40
codegen_flags: <defaults>
</compile_context>

<pallas_src>
import functools

import numpy as np
import jax
import jax.numpy as jnp
from jax import lax
from jax.experimental import pallas as pl
from jax.experimental.pallas import tpu as pltpu


def _round_up(x, m):
    return ((x + m - 1) // m) * m


def _blk_bytes(shape, itemsize):
    """VMEM bytes of one buffered block, accounting for (sublane, lane) padding
    of the last two dims (8/16/32 sublanes for 4/2/1-byte dtypes, 128 lanes)."""
    shape = tuple(int(d) for d in shape)
    if len(shape) < 2:
        shape = (1,) * (2 - len(shape)) + shape
    lead = 1
    for d in shape[:-2]:
        lead *= d
    sub = _round_up(shape[-2], 8 * max(1, 4 // itemsize))
    lane = _round_up(shape[-1], 128)
    return lead * sub * lane * itemsize


def _vmem_limit(block_bytes):
    # blocks (double-buffering already counted by the caller) + headroom,
    # clamped to stay comfortably under v7x's 64 MiB physical VMEM.
    return int(min(max(block_bytes + (4 << 20), 16 << 20), 48 << 20))


# ---------------------------------------------------------------------------
# Kernel A: alpha_mlp + per-tile GroupNorm partial statistics
# ---------------------------------------------------------------------------
def _mlp_stats_kernel(pooled_ref, w1_ref, w2_ref, wraw_ref, stats_ref):
    x = pooled_ref[...]                                                  # (tm, C) bf16
    h = jnp.dot(x, w1_ref[...], preferred_element_type=jnp.float32)      # (tm, Cmid)
    h = jnp.where(h >= 0.0, h, 0.1 * h)                                  # LeakyReLU(0.1)
    w = jnp.dot(h.astype(jnp.bfloat16), w2_ref[...],
                preferred_element_type=jnp.float32)                      # (tm, KCp) f32

    # Lane-dense bf16 slab (stats below stay f32, so precision is unaffected).
    wraw_ref[...] = w.astype(wraw_ref.dtype)

    # Per-tile partial sums -> no cross-step dependency, grid stays parallel.
    kcp = w.shape[1]
    stats_ref[0:1, :] = jnp.sum(w, axis=0, keepdims=True)
    stats_ref[1:2, :] = jnp.sum(w * w, axis=0, keepdims=True)
    stats_ref[2:8, :] = jnp.zeros((6, kcp), jnp.float32)


# ---------------------------------------------------------------------------
# Kernel B: geometry + involution aggregation (gather done outside with XLA)
# ---------------------------------------------------------------------------
def _kpinv_main_kernel(nbp_ref, nbf_ref, kpt_ref, w_ref, scale_ref, shift_ref,
                       rexp_ref, out_ref, wexp_scr, *,
                       tm, H, K, C, inv_sigma, static_h):
    # GroupNorm affine on the lane-dense conv-weight slab (once per tile), then
    # per-kernel-point channel expansion on the otherwise-idle MXU, staged into
    # VMEM scratch so vreg live ranges stay bounded (no K*(tm,C) spill).
    w_aff = w_ref[...].astype(jnp.float32) * scale_ref[...] + shift_ref[...]   # (tm, KCp)
    for k in range(K):
        wexp_scr[k] = jnp.dot(w_aff, rexp_ref[k],
                              preferred_element_type=jnp.float32)              # (tm, C)

    kpt = kpt_ref[...]                                          # (3, K) f32
    iota_k = lax.broadcasted_iota(jnp.int32, (tm, K), 1)        # hoisted (no in-loop CSE)

    def body(h, acc):
        nb = nbp_ref[h]                                         # (tm, 3) f32, rel. to query
        feats = nbf_ref[h].astype(jnp.float32)                  # (tm, C)

        # Per-coordinate squared distances (VPU, no a^2+b^2-2ab cancellation).
        # The inf-padded neighbor gives a huge distance -> influence clamps to
        # 0 and its features are zero, so it never contributes.
        sqd = jnp.zeros((tm, K), jnp.float32)
        for d in range(3):
            diff = nb[:, d:d + 1] - kpt[d:d + 1, :]
            sqd = sqd + diff * diff

        mn = jnp.min(sqd, axis=1, keepdims=True)                # (tm, 1)
        # first index of the minimum (same tie-break as torch.min)
        nn1 = jnp.min(jnp.where(sqd <= mn, iota_k, K), axis=1, keepdims=True)
        # influence_mode == 'linear'
        infl = jnp.maximum(1.0 - jnp.sqrt(mn) * inv_sigma, 0.0)

        # Nearest-kernel-point weight gather: K-long select/FMA (pure VPU) over
        # the pre-expanded per-kernel-point weights held in VMEM scratch.
        wsel = jnp.zeros((tm, C), jnp.float32)
        for k in range(K):
            wsel = wsel + jnp.where(nn1 == k, wexp_scr[k], 0.0)

        # weight_act == 'none'; merge = mul, aggr = sum over neighbors.
        return acc + feats * (wsel * infl)

    acc = jnp.zeros((tm, C), jnp.float32)
    if static_h:
        for h in range(H):
            acc = body(h, acc)
    else:
        # Bound vreg live ranges / instruction count for many neighbors.
        acc = lax.fori_loop(0, H, body, acc, unroll=2)
    out_ref[...] = acc.astype(out_ref.dtype)


# ---------------------------------------------------------------------------
# Wrapper
# ---------------------------------------------------------------------------
def kpinv_forward(q_pts, s_pts, s_feats, neighb_inds, params, *,
                  shell_sizes, radius, sigma, groups, inf=1e6, tm=None):
    del radius  # geometry already baked into params["kernel_points"]
    M = q_pts.shape[0]
    N, C = s_feats.shape
    H = neighb_inds.shape[1]
    K = int(np.sum(shell_sizes))
    G = groups
    assert C % G == 0
    cpg = C // G
    KC = K * cpg
    KCp = _round_up(KC, 128)           # lane-dense conv-weight slab width
    Cmid = params["w1"].shape[1]

    f32, bf16 = jnp.float32, jnp.bfloat16

    if tm is None:
        # Large point tiles fill the MXU M-dim and amortize the ~0.35us/step
        # pipeline overhead; 256 targets the 256-wide MXU of v6e/v7x.
        if M >= 256:
            tm = 256
        elif M >= 128:
            tm = 128
        else:
            tm = _round_up(M, 8)
    M_pad = _round_up(M, tm)
    n_tiles = M_pad // tm

    neighb_inds = neighb_inds.astype(jnp.int32)

    # Padded source cloud: row N is the 'inf' padding point with zero features.
    s_pts_pad = jnp.concatenate([s_pts.astype(f32), jnp.full((1, 3), inf, f32)], 0)
    s_feats_pad = jnp.concatenate([s_feats.astype(f32), jnp.zeros((1, C), f32)], 0)

    pooled = s_feats.astype(f32) if M == N else s_feats_pad[neighb_inds[:, 0]]

    # Pad the query dimension; padded rows select the padding neighbor (zero
    # features, zero influence) so they contribute exact zeros everywhere.
    q_pad = jnp.zeros((M_pad, 3), f32).at[:M].set(q_pts.astype(f32))
    inds_pad = jnp.full((M_pad, H), N, jnp.int32).at[:M].set(neighb_inds)
    pooled_pad = jnp.zeros((M_pad, C), f32).at[:M].set(pooled)

    # Neighbor pre-gather with XLA take (replaces the O(N) in-kernel one-hot
    # matmul gather).  Neighbor-major layout so Kernel B indexes the leading
    # axis per neighbor; features in bf16 (half the HBM traffic), relative
    # positions in f32 (geometry precision).
    # TODO(synk): for very large M*H, switch to a manual DMA gather with
    # scalar-prefetched indices and memory_space=pl.ANY to avoid materializing
    # the (H, M, C) intermediate in HBM.
    inds_t = inds_pad.T                                                    # (H, M_pad)
    nb_feats = jnp.take(s_feats_pad, inds_t, axis=0).astype(bf16)          # (H, M_pad, C)
    nb_rel = jnp.take(s_pts_pad, inds_t, axis=0) - q_pad[None, :, :]       # (H, M_pad, 3)

    w1 = params["w1"].astype(bf16)
    w2p = jnp.zeros((Cmid, KCp), f32).at[:, :KC].set(params["w2"]).astype(bf16)

    grid = (n_tiles,)

    # ---- Kernel A: alpha_mlp + per-tile GroupNorm partial sums -------------
    a_bytes = 2 * (_blk_bytes((tm, C), 2) + _blk_bytes((C, Cmid), 2)
                   + _blk_bytes((Cmid, KCp), 2) + _blk_bytes((tm, KCp), 2)
                   + _blk_bytes((8, KCp), 4))
    wraw, stats = pl.pallas_call(
        _mlp_stats_kernel,
        out_shape=(jax.ShapeDtypeStruct((M_pad, KCp), bf16),
                   jax.ShapeDtypeStruct((n_tiles * 8, KCp), f32)),
        grid_spec=pltpu.PrefetchScalarGridSpec(
            num_scalar_prefetch=0,
            grid=grid,
            in_specs=[
                pl.BlockSpec((tm, C), lambda i: (i, 0)),
                pl.BlockSpec((C, Cmid), lambda i: (0, 0)),
                pl.BlockSpec((Cmid, KCp), lambda i: (0, 0)),
            ],
            out_specs=[
                pl.BlockSpec((tm, KCp), lambda i: (i, 0)),
                pl.BlockSpec((8, KCp), lambda i: (i, 0)),
            ],
        ),
        compiler_params=pltpu.CompilerParams(
            dimension_semantics=("parallel",),
            vmem_limit_bytes=_vmem_limit(a_bytes)),
    )(pooled_pad.astype(bf16), w1, w2p)

    # ---- GroupNorm(K) stats -> per-(kernel point, group channel) affine -----
    stats = stats.reshape(n_tiles, 8, KCp)
    cnt = float(M * cpg)            # padded rows are exact zeros in both sums
    gsum = stats[:, 0, :KC].sum(axis=0).reshape(K, cpg).sum(axis=1)
    gsq = stats[:, 1, :KC].sum(axis=0).reshape(K, cpg).sum(axis=1)
    mean = gsum / cnt
    # biased variance (same as nn.GroupNorm); clamp >= 0 before rsqrt.
    var = jnp.maximum(gsq / cnt - mean * mean, 0.0)
    invstd = lax.rsqrt(var + 1e-5)
    gamma = params["gn_gamma"].astype(f32).reshape(K, cpg)
    beta = params["gn_beta"].astype(f32).reshape(K, cpg)
    scale_kc = (invstd[:, None] * gamma).reshape(KC)
    shift_kc = (beta - mean[:, None] * invstd[:, None] * gamma).reshape(KC)
    scale_pad = jnp.zeros((1, KCp), f32).at[0, :KC].set(scale_kc)
    shift_pad = jnp.zeros((1, KCp), f32).at[0, :KC].set(shift_kc)

    # Per-kernel-point one-hot channel-expansion matrices (feature channel c
    # uses group channel c // G); consumed by otherwise-idle MXU matmuls in
    # Kernel B, which avoids lane-repeat/reshape relayouts on the VPU/XLU.
    rows = jnp.arange(KCp)
    targ = jnp.arange(K)[:, None, None] * cpg + (jnp.arange(C)[None, None, :] // G)
    rexp_all = (rows[None, :, None] == targ).astype(f32)                   # (K, KCp, C)

    kp_t = params["kernel_points"].astype(f32).T                           # (3, K)

    static_h = H <= 8
    main = functools.partial(_kpinv_main_kernel, tm=tm, H=H, K=K, C=C,
                             inv_sigma=1.0 / float(sigma), static_h=static_h)

    b_bytes = (2 * (_blk_bytes((H, tm, 3), 4) + _blk_bytes((H, tm, C), 2)
                    + _blk_bytes((3, K), 4) + _blk_bytes((tm, KCp), 2)
                    + 2 * _blk_bytes((1, KCp), 4) + _blk_bytes((K, KCp, C), 4)
                    + _blk_bytes((tm, C), 4))
               + _blk_bytes((K, tm, C), 4))
    out = pl.pallas_call(
        main,
        out_shape=jax.ShapeDtypeStruct((M_pad, C), f32),
        grid_spec=pltpu.PrefetchScalarGridSpec(
            num_scalar_prefetch=0,
            grid=grid,
            in_specs=[
                pl.BlockSpec((H, tm, 3), lambda i: (0, i, 0)),
                pl.BlockSpec((H, tm, C), lambda i: (0, i, 0)),
                pl.BlockSpec((3, K), lambda i: (0, 0)),
                pl.BlockSpec((tm, KCp), lambda i: (i, 0)),
                pl.BlockSpec((1, KCp), lambda i: (0, 0)),
                pl.BlockSpec((1, KCp), lambda i: (0, 0)),
                pl.BlockSpec((K, KCp, C), lambda i: (0, 0, 0)),
            ],
            out_specs=pl.BlockSpec((tm, C), lambda i: (i, 0)),
            scratch_shapes=[pltpu.VMEM((K, tm, C), jnp.float32)],
        ),
        compiler_params=pltpu.CompilerParams(
            dimension_semantics=("parallel",),
            vmem_limit_bytes=_vmem_limit(b_bytes)),
    )(nb_rel, nb_feats, kp_t, wraw, scale_pad, shift_pad, rexp_all)

    return out[:M]


# ---------------------------------------------------------------------------
# Deterministic parameter / kernel-point setup
# ---------------------------------------------------------------------------
def _fib_sphere(n):
    i = np.arange(n, dtype=np.float64) + 0.5
    phi = np.arccos(1.0 - 2.0 * i / n)
    theta = np.pi * (1.0 + 5.0 ** 0.5) * i
    return np.stack([np.cos(theta) * np.sin(phi),
                     np.sin(theta) * np.sin(phi),
                     np.cos(phi)], axis=1)


def init_kernel_points(radius, shell_sizes, fixed='center'):
    # TODO(synk): original load_kernels() optimizes point dispositions; here we
    # use a deterministic placement (center point + Fibonacci-sphere shells).
    pts = []
    n_shells = len(shell_sizes)
    for s, n in enumerate(shell_sizes):
        if s == 0 and n == 1 and fixed == 'center':
            pts.append(np.zeros((1, 3)))
        else:
            r = radius * (s / max(n_shells - 1, 1)) if n_shells > 1 else radius
            pts.append(_fib_sphere(n) * r)
    return np.concatenate(pts, axis=0).astype(np.float32)


def init_params(key, C, Cmid, K, cpg, radius, shell_sizes):
    k1, k2 = jax.random.split(key, 2)
    KC = K * cpg
    b1 = 1.0 / np.sqrt(C)
    b2 = 1.0 / np.sqrt(Cmid)
    # TODO(synk): build_mlp's UnaryBlock may add bias terms; modeled here as
    # bias-free Linear layers (norm_type='none').
    return {
        "w1": jax.random.uniform(k1, (C, Cmid), jnp.float32, -b1, b1),
        "w2": jax.random.uniform(k2, (Cmid, KC), jnp.float32, -b2, b2),
        "gn_gamma": jnp.ones((KC,), jnp.float32),
        "gn_beta": jnp.zeros((KC,), jnp.float32),
        "kernel_points": jnp.asarray(init_kernel_points(radius, shell_sizes)),
    }


# ---------------------------------------------------------------------------
# Pure NumPy reference (mirrors the PyTorch forward)
# ---------------------------------------------------------------------------
def reference_forward(q, s, f, inds, kp, w1, w2, gamma, beta, sigma, G, inf):
    q, s, f, kp = map(np.asarray, (q, s, f, kp))
    inds = np.asarray(inds)
    w1, w2, gamma, beta = map(np.asarray, (w1, w2, gamma, beta))
    M, H = inds.shape
    N, C = f.shape
    K = kp.shape[0]
    cpg = C // G
    s_pad = np.concatenate([s, np.full((1, 3), inf, np.float32)], 0)
    f_pad = np.concatenate([f, np.zeros((1, C), np.float32)], 0)
    nb_f = f_pad[inds]                                   # (M,H,C)
    nb = s_pad[inds] - q[:, None, :]                     # (M,H,3)
    sqd = ((nb[:, :, None, :] - kp[None, None]) ** 2).sum(-1)   # (M,H,K)
    nn_sq = sqd.min(-1)
    nn1 = sqd.argmin(-1)
    infl = np.clip(1.0 - np.sqrt(nn_sq) / sigma, 0.0, None)
    pooled = f if M == N else nb_f[:, 0, :]
    h = pooled @ w1
    h = np.where(h >= 0, h, 0.1 * h)
    cw = h @ w2
    cw3 = cw.reshape(M, K, cpg)
    mean = cw3.mean(axis=(0, 2), keepdims=True)
    var = cw3.var(axis=(0, 2), keepdims=True)
    cwn = (cw3 - mean) / np.sqrt(var + 1e-5)
    cwn = cwn * gamma.reshape(1, K, cpg) + beta.reshape(1, K, cpg)
    nw = cwn[np.arange(M)[:, None], nn1]                 # (M,H,cpg)
    nw = nw * infl[..., None]
    nf = nb_f.reshape(M, H, cpg, G)
    return (nf * nw[..., None]).sum(axis=1).reshape(M, C)


def _run_case(case_key, M, N, C, H, groups, shell_sizes, radius, sigma, inf=1e6):
    K = int(np.sum(shell_sizes))
    cpg = C // groups
    Cmid = C  # reduction_ratio = 1
    kp_key, kf_key, ki_key, kparam = jax.random.split(case_key, 4)

    s_pts = jax.random.uniform(kp_key, (N, 3), jnp.float32) * 0.8
    q_pts = s_pts if M == N else s_pts[:M]
    s_feats = jax.random.normal(kf_key, (N, C), jnp.float32)
    neighb_inds = jax.random.randint(ki_key, (M, H), 0, N + 1, dtype=jnp.int32)

    params = init_params(kparam, C, Cmid, K, cpg, radius, shell_sizes)

    out = kpinv_forward(q_pts, s_pts, s_feats, neighb_inds, params,
                        shell_sizes=shell_sizes, radius=radius, sigma=sigma,
                        groups=groups, inf=inf)
    out = np.asarray(jax.block_until_ready(out))

    ref = reference_forward(q_pts, s_pts, s_feats, neighb_inds,
                            params["kernel_points"], params["w1"], params["w2"],
                            params["gn_gamma"], params["gn_beta"],
                            sigma, groups, inf)

    # Tolerance covers the bf16 operands (MLP matmuls, bf16 feature gather and
    # the bf16-stored conv-weight slab).
    if not np.allclose(out, ref, rtol=8e-2, atol=8e-2):
        raise AssertionError(
            f"Mismatch vs reference (M={M}, N={N}, H={H}): "
            f"max abs diff = {np.abs(out - ref).max()}")


# ---------------------------------------------------------------------------
if __name__ == "__main__":
    base_key = jax.random.PRNGKey(0)
    key1, key2 = jax.random.split(base_key)

    # Case 1: M == N (pooled_feats = s_feats), H <= 8 -> static neighbor loop.
    _run_case(key1, M=16, N=16, C=32, H=8, groups=8,
              shell_sizes=[1, 14], radius=1.0, sigma=0.6)

    # Case 2: M != N (pooled from first neighbor), H > 8 -> fori_loop path.
    _run_case(key2, M=8, N=16, C=32, H=12, groups=8,
              shell_sizes=[1, 14], radius=1.0, sigma=0.6)

    print("KERNEL_OK")
</pallas_src>

<mosaic_0001>
module attributes {stable_mosaic.version = 11 : i64} {
  func.func @_mlp_stats_kernel(%arg0: i32, %arg1: memref<16x32xbf16, #tpu.memory_space<vmem>>, %arg2: memref<32x32xbf16, #tpu.memory_space<vmem>>, %arg3: memref<32x128xbf16, #tpu.memory_space<vmem>>, %arg4: memref<16x128xbf16, #tpu.memory_space<vmem>>, %arg5: memref<8x128xf32, #tpu.memory_space<vmem>>) attributes {dimension_semantics = [#tpu.dimension_semantics<parallel>], iteration_bounds = array<i64: 1>, scalar_prefetch = 0 : i64, scratch_operands = 0 : i64, tpu.core_type = #tpu.core_type<tc>, window_params = [{transform_indices = @transform_0, window_bounds = array<i64: 16, 32>}, {pipeline_mode = #tpu.pipeline_mode<synchronous>, transform_indices = @transform_1, window_bounds = array<i64: 32, 32>}, {pipeline_mode = #tpu.pipeline_mode<synchronous>, transform_indices = @transform_2, window_bounds = array<i64: 32, 128>}, {transform_indices = @transform_3, window_bounds = array<i64: 16, 128>}, {transform_indices = @transform_4, window_bounds = array<i64: 8, 128>}]} {
    %c0 = arith.constant 0 : index
    %c0_0 = arith.constant 0 : index
    %0 = vector.load %arg1[%c0, %c0_0] : memref<16x32xbf16, #tpu.memory_space<vmem>>, vector<16x32xbf16>
    %c0_1 = arith.constant 0 : index
    %c0_2 = arith.constant 0 : index
    %1 = vector.load %arg2[%c0_1, %c0_2] : memref<32x32xbf16, #tpu.memory_space<vmem>>, vector<32x32xbf16>
    %cst = arith.constant dense<0.000000e+00> : vector<16x32xf32>
    %2 = tpu.matmul %0, %1, %cst {dimension_numbers = #tpu.dot_dimension_numbers<[1], [0], [0], [1], [0, 0, 1, 1], [], []>} : vector<16x32xbf16>, vector<32x32xbf16>, vector<16x32xf32> -> vector<16x32xf32>
    %cst_3 = arith.constant 0.000000e+00 : f32
    %3 = vector.broadcast %cst_3 : f32 to vector<16x32xf32>
    %4 = arith.cmpf oge, %2, %3 : vector<16x32xf32>
    %cst_4 = arith.constant 1.000000e-01 : f32
    %5 = vector.broadcast %cst_4 : f32 to vector<16x32xf32>
    %6 = arith.mulf %5, %2 : vector<16x32xf32>
    %7 = arith.select %4, %2, %6 : vector<16x32xi1>, vector<16x32xf32>
    %8 = arith.truncf %7 : vector<16x32xf32> to vector<16x32xbf16>
    %c0_5 = arith.constant 0 : index
    %c0_6 = arith.constant 0 : index
    %9 = vector.load %arg3[%c0_5, %c0_6] : memref<32x128xbf16, #tpu.memory_space<vmem>>, vector<32x128xbf16>
    %cst_7 = arith.constant dense<0.000000e+00> : vector<16x128xf32>
    %10 = tpu.matmul %8, %9, %cst_7 {dimension_numbers = #tpu.dot_dimension_numbers<[1], [0], [0], [1], [0, 0, 1, 1], [], []>} : vector<16x32xbf16>, vector<32x128xbf16>, vector<16x128xf32> -> vector<16x128xf32>
    %11 = arith.truncf %10 : vector<16x128xf32> to vector<16x128xbf16>
    %c0_8 = arith.constant 0 : index
    %c0_9 = arith.constant 0 : index
    %12 = vector.load %arg4[%c0_8, %c0_9] : memref<16x128xbf16, #tpu.memory_space<vmem>>, vector<16x128xbf16>
    tpu.vector_store %arg4[%c0_8, %c0_9], %11 {strides = array<i32>} : memref<16x128xbf16, #tpu.memory_space<vmem>>, vector<16x128xbf16>,
    %cst_10 = arith.constant dense<0.000000e+00> : vector<128xf32>
    %13 = vector.multi_reduction <add>, %10, %cst_10 [0] : vector<16x128xf32> to vector<128xf32>
    %14 = vector.shape_cast %13 : vector<128xf32> to vector<1x128xf32>
    %c0_11 = arith.constant 0 : index
    %c0_12 = arith.constant 0 : index
    %15 = vector.load %arg5[%c0_11, %c0_12] : memref<8x128xf32, #tpu.memory_space<vmem>>, vector<1x128xf32>
    tpu.vector_store %arg5[%c0_11, %c0_12], %14 {strides = array<i32>} : memref<8x128xf32, #tpu.memory_space<vmem>>, vector<1x128xf32>,
    %16 = arith.mulf %10, %10 : vector<16x128xf32>
    %cst_13 = arith.constant dense<0.000000e+00> : vector<128xf32>
    %17 = vector.multi_reduction <add>, %16, %cst_13 [0] : vector<16x128xf32> to vector<128xf32>
    %18 = vector.shape_cast %17 : vector<128xf32> to vector<1x128xf32>
    %c1 = arith.constant 1 : index
    %c0_14 = arith.constant 0 : index
    %19 = vector.load %arg5[%c1, %c0_14] : memref<8x128xf32, #tpu.memory_space<vmem>>, vector<1x128xf32>
    tpu.vector_store %arg5[%c1, %c0_14], %18 {strides = array<i32>} : memref<8x128xf32, #tpu.memory_space<vmem>>, vector<1x128xf32>,
    %cst_15 = arith.constant 0.000000e+00 : f32
    %20 = vector.broadcast %cst_15 : f32 to vector<6x128xf32>
    %c2 = arith.constant 2 : index
    %c0_16 = arith.constant 0 : index
    %21 = vector.load %arg5[%c2, %c0_16] : memref<8x128xf32, #tpu.memory_space<vmem>>, vector<6x128xf32>
    tpu.vector_store %arg5[%c2, %c0_16], %20 {strides = array<i32>} : memref<8x128xf32, #tpu.memory_space<vmem>>, vector<6x128xf32>,
    return
  }
  func.func @transform_0(%arg0: i32) -> (i32, i32) {
    %c0_i32 = arith.constant 0 : i32
    %c0_i32_0 = arith.constant 0 : i32
    return %arg0, %c0_i32 : i32, i32
  }
  func.func @transform_1(%arg0: i32) -> (i32, i32) {
    %c0_i32 = arith.constant 0 : i32
    %c0_i32_0 = arith.constant 0 : i32
    %c0_i32_1 = arith.constant 0 : i32
    return %c0_i32, %c0_i32_0 : i32, i32
  }
  func.func @transform_2(%arg0: i32) -> (i32, i32) {
    %c0_i32 = arith.constant 0 : i32
    %c0_i32_0 = arith.constant 0 : i32
    %c0_i32_1 = arith.constant 0 : i32
    return %c0_i32, %c0_i32_0 : i32, i32
  }
  func.func @transform_3(%arg0: i32) -> (i32, i32) {
    %c0_i32 = arith.constant 0 : i32
    %c0_i32_0 = arith.constant 0 : i32
    return %arg0, %c0_i32 : i32, i32
  }
  func.func @transform_4(%arg0: i32) -> (i32, i32) {
    %c0_i32 = arith.constant 0 : i32
    %c0_i32_0 = arith.constant 0 : i32
    return %arg0, %c0_i32 : i32, i32
  }
}

</mosaic_0001>

<bundles_post_ra>
// kernel: tpu_custom_call.1
= control target key start
LH: loop header
LB: loop body
LE: loop exit
PB: predicated region body
PF: predicated region fallthrough
CT: control target
= control target key end

     0   :  { %10 = vsyncpa [#allocation3], 0  ;;  %s434_s0 = inlined_call_operand.hbm [shape: bf16[16,32], index: 0, kind: input, shape index: {}]   ;;  %s435_s1 = inlined_call_operand.hbm [shape: bf16[32,32], index: 1, kind: input, shape index: {}]   ;;  %s436_s2 = inlined_call_operand.hbm [shape: bf16[32,128], index: 2, kind: input, shape index: {}]   ;;  %s437_s3 = inlined_call_operand.hbm [shape: bf16[16,128], index: 3, kind: output, shape index: {0}]   ;;  %s438_s4 = inlined_call_operand.hbm [shape: f32[8,128], index: 4, kind: output, shape index: {1}]  }
   0x1   :  { %11 = vsyncpa [#allocation6], 0 }
   0x2   :  { %12 = vsyncpa [#allocation4], 0 }
   0x3   :  { %13 = vsyncpa [#allocation10], 0  ;;  %s31_s17 = sshll.u32 %s435_s1, 4  ;;  %s374_s18 = smov [#allocation5]   ;;  %s32_s17 = int_to_ptr.hbm [resolvable:$true] %s31_s17 }
   0x4   :  { %s33_s19 = sshll.u32 %s374_s18, 4  ;;  %s18_s22 = sshll.u32 %s434_s0, 4  ;;  %s34_s19 = int_to_ptr.vmem [resolvable:$true] %s33_s19  ;;  %s19_s22 = int_to_ptr.hbm [resolvable:$true] %s18_s22 }
   0x5   :  { %s375_s23 = smov 64   ;;  %s376_s24 = smov 4  }
   0x6   :  { %39 = dma.hbm_to_vmem [thread:$0]  %s32_s17, 256, %s34_s19, [#allocation6], %s375_s23, %s375_s23, %s376_s24  }
   0x7   :  { %s377_s25 = smov [#allocation2]   ;;  %s44_s1 = sshll.u32 %s436_s2, 4  ;;  %s45_s1 = int_to_ptr.hbm [resolvable:$true] %s44_s1 }
   0x8   :  { %s20_s26 = sshll.u32 %s377_s25, 4  ;;  %s378_s0 = smov [#allocation7]   ;;  %s21_s26 = int_to_ptr.vmem [resolvable:$true] %s20_s26 }
   0x9   :  { %26 = dma.hbm_to_vmem [thread:$0]  %s19_s22, 128, %s21_s26, [#allocation3], %s375_s23, %s375_s23, %s376_s24  }
   0xa   :  { %s46_s29 = sshll.u32 %s378_s0, 4  ;;  %s47_s29 = int_to_ptr.vmem [resolvable:$true] %s46_s29 }
   0xb   :  { %52 = dma.hbm_to_vmem [thread:$0]  %s45_s1, 256, %s47_s29, [#allocation6], %s375_s23, %s375_s23, %s376_s24  }
   0xc   :  { %366 = dma.done.wait [#allocation3], 128  }
   0xd   :  { %367 = vsyncadd [#allocation3], 4294967168 }
   0xe   :  { %368 = dma.done.wait [#allocation6], 512  }
   0xf   :  { %369 = vsyncadd [#allocation6], 4294966784  ;;  %v230_v0 = vld [vmem:[#allocation5 + $0x8] sm:$0xff]  ;;  %v229_v1 = vld [vmem:[#allocation5] sm:$0xff]  ;;  %vm89_vm0 = vcmask 261120   ;;  %v379_v12 = vmov 0.0  }
  0x10   :  { %99 = vmatpush.bf16.msra.mxu0 %v230_v0  ;;  %v228_v2 = vld [vmem:[#allocation2] sm:$0xff]  ;;  %v231_v4 = vld [vmem:[#allocation7] sm:$0xff]  ;;  %169 = vst [vmem:[#allocation9 + $0x2] sm:$0x3f] %v379_v12  ;;  %s380_s2 = smov [#allocation8]   ;;  %s176_s7 = sshll.u32 %s437_s3, 4  ;;  %s177_s7 = int_to_ptr.hbm [resolvable:$true] %s176_s7 }
  0x11   :  { %v232_v3 = vld [vmem:[#allocation7 + $0x8] sm:$0xff]  ;;  %s174_s30 = sshll.u32 %s380_s2, 4  ;;  %s381_s3 = smov [#allocation9]   ;;  %s175_s30 = int_to_ptr.vmem [resolvable:$true] %s174_s30 }
  0x12   :  { %139 = vmatpush.bf16.msra.mxu1 %v232_v3  ;;  %s188_s8 = sshll.u32 %s381_s3, 4  ;;  %s190_s11 = sshll.u32 %s438_s4, 4  ;;  %s189_s8 = int_to_ptr.vmem [resolvable:$true] %s188_s8  ;;  %s191_s11 = int_to_ptr.hbm [resolvable:$true] %s190_s11 }
  0x14   :  { %100 = vmatpush.bf16.msra.mxu0 %v229_v1 }
  0x16   :  { %140 = vmatpush.bf16.msra.mxu1 %v231_v4 }
  0x17   :  { %218 = vmatmul.msk.bf16.vlgmr.msra.gmra.mxu0 %vm89_vm0, %v228_v2 }
  0x94   :  { %v102_v5 = vpop.f32.mrf.mxu0 }
  0x95   :  { %v109_v6 = vmul.f32 0.1, %v102_v5  ;;  %vm107_vm1 = vcmp.ge.f32.partialorder %v102_v5, 0.0 }
  0x97   :  { %v111_v9 = vsel %vm107_vm1, %v102_v5, %v109_v6 }
  0x9c   :  { %v104_v7 = vpop.f32.mrf.mxu0 }
  0x9d   :  { %vm108_vm2 = vcmp.ge.f32.partialorder %v104_v7, 0.0  ;;  %v110_v8 = vmul.f32 0.1, %v104_v7 }
  0x9f   :  { %v112_v10 = vsel %vm108_vm2, %v104_v7, %v110_v8 }
  0xa0   :  { %v113_v11 = vpack.c.bf16 %v112_v10, %v111_v9 }
  0xa2   :  { %227 = vmatmul.msk.bf16.vlgmr.msra.gmra.mxu1 %vm89_vm0, %v113_v11 }
 0x11f   :  { %v142_v13 = vpop.f32.mrf.mxu1 }
 0x120   :  { %v159_v15 = vmul.f32 %v142_v13, %v142_v13 }
 0x127   :  { %v144_v14 = vpop.f32.mrf.mxu1 }
 0x128   :  { %v236_v16 = vpack.c.bf16 %v144_v14, %v142_v13  ;;  %v151_v17 = vadd.f32 %v144_v14, %v142_v13  ;;  %v160_v18 = vmul.f32 %v144_v14, %v144_v14 }
 0x12a   :  { %v152_v19 = vrot.slane %v151_v17, 4  ;;  %v161_v20 = vadd.f32 %v160_v18, %v159_v15  ;;  %237 = vst [vmem:[#allocation8] sm:$0xff] %v236_v16  }
 0x12b   :  { %182 = dma.vmem_to_hbm [thread:$0]  %s175_s30, 128, %s177_s7, [#allocation4], %s375_s23, %s375_s23, %s376_s24  }
 0x12c   :  { %v153_v21 = vadd.f32 %v152_v19, %v151_v17  ;;  %v162_v22 = vrot.slane %v161_v20, 4 }
 0x12e   :  { %v154_v23 = vrot.slane %v153_v21, 2  ;;  %v163_v24 = vadd.f32 %v162_v22, %v161_v20 }
 0x130   :  { %v155_v25 = vadd.f32 %v154_v23, %v153_v21  ;;  %v164_v26 = vrot.slane %v163_v24, 2 }
 0x132   :  { %v156_v27 = vrot.slane %v155_v25, 1  ;;  %v165_v28 = vadd.f32 %v164_v26, %v163_v24 }
 0x134   :  { %v157_v29 = vadd.f32 %v156_v27, %v155_v25  ;;  %v166_v30 = vrot.slane %v165_v28, 1 }
 0x136   :  { %v167_v31 = vadd.f32 %v166_v30, %v165_v28  ;;  %158 = vst [vmem:[#allocation9] sm:$0x1] %v157_v29 }
 0x138   :  { %168 = vst [vmem:[#allocation9 + $0x1] sm:$0x1] %v167_v31 }
 0x139   :  { %193 = dma.vmem_to_hbm [thread:$0]  %s189_s8, 128, %s191_s11, [#allocation10]  }
 0x13a   :  { %370 = dma.done.wait [#allocation4], 128  }
 0x13b   :  { %371 = vsyncadd [#allocation4], 4294967168 }
 0x13c   :  { %372 = dma.done.wait [#allocation10], 128  }
 0x13d   :  { %373 = vsyncadd [#allocation10], 4294967168 }
 0x13e   :  { %202 = vsyncpa [#allocation3], 1 }
 0x13f   :  { %203 = vsyncpa [#allocation6], 1 }
 0x140   :  { %204 = vsyncpa [#allocation4], 1 }
 0x141   :  { %205 = vsyncpa [#allocation10], 1 }

</bundles_post_ra>
